<compile_context>
chip_gen: v5e
topology: v5e:2x2
jax: 0.10.0
libtpu: 0.0.40
codegen_flags: <defaults>
</compile_context>

<pallas_src>
import functools

import jax
import jax.numpy as jnp
from jax.experimental import pallas as pl
from jax.experimental.pallas import tpu as pltpu

_LANE = 128


def _round_up(n, m):
    return ((n + m - 1) // m) * m


def _ae_kernel(
    x_ref,
    w_e1, b_e1, w_e2, b_e2, w_e3, b_e3, w_z, b_z,
    w_d1, b_d1, w_d2, b_d2, w_d3, b_d3, w_xb, b_xb,
    xbar_ref, h1_ref, h2_ref, h3_ref, z_ref,
    *, compute_dtype,
):
    def linear(a, w_ref, b_ref):
        # a: [TB, in] fp32, w_ref: [in, out] compute_dtype, b_ref: [1, out] fp32
        acc = jnp.dot(a.astype(compute_dtype), w_ref[...],
                      preferred_element_type=jnp.float32)
        return acc + b_ref[...]

    def relu(a):
        return jnp.maximum(a, 0.0)

    x = x_ref[...]

    h1 = relu(linear(x, w_e1, b_e1))
    h1_ref[...] = h1.astype(h1_ref.dtype)          # store early -> retire buffer

    h2 = relu(linear(h1, w_e2, b_e2))
    h2_ref[...] = h2.astype(h2_ref.dtype)

    h3 = relu(linear(h2, w_e3, b_e3))
    h3_ref[...] = h3.astype(h3_ref.dtype)

    z = linear(h3, w_z, b_z)                        # no ReLU on z (matches torch)
    z_ref[...] = z.astype(z_ref.dtype)

    d1 = relu(linear(z, w_d1, b_d1))
    d2 = relu(linear(d1, w_d2, b_d2))
    d3 = relu(linear(d2, w_d3, b_d3))
    x_bar = linear(d3, w_xb, b_xb)                  # no ReLU on x_bar
    xbar_ref[...] = x_bar.astype(xbar_ref.dtype)


def init_ae_params(key, n_enc_1, n_enc_2, n_enc_3,
                   n_dec_1, n_dec_2, n_dec_3, n_input, n_z):
    """Deterministic parameter init (Kaiming-uniform-ish, like torch Linear)."""
    dims = [
        (n_input, n_enc_1), (n_enc_1, n_enc_2), (n_enc_2, n_enc_3),
        (n_enc_3, n_z),
        (n_z, n_dec_1), (n_dec_1, n_dec_2), (n_dec_2, n_dec_3),
        (n_dec_3, n_input),
    ]
    params = []
    for i, (fan_in, fan_out) in enumerate(dims):
        kw, kb = jax.random.split(jax.random.fold_in(key, i))
        bound = 1.0 / jnp.sqrt(float(fan_in))
        # weight stored as (in, out) == torch weight (out, in) transposed
        w = jax.random.uniform(kw, (fan_in, fan_out), jnp.float32, -bound, bound)
        b = jax.random.uniform(kb, (1, fan_out), jnp.float32, -bound, bound)
        params.append((w, b))
    return params


@functools.partial(jax.jit, static_argnames=("tile_b", "compute_dtype"))
def ae_forward(x, params, *, tile_b=256, compute_dtype=jnp.bfloat16):
    """Returns (x_bar, enc_h1, enc_h2, enc_h3, z), matching the torch module."""
    batch, n_input = x.shape
    dims_in = [w.shape[0] for w, _ in params]
    dims_out = [w.shape[1] for w, _ in params]
    assert dims_in[0] == n_input and dims_out[-1] == n_input

    # Lane-dense (multiple-of-128) padded feature dims.
    p_in = [_round_up(d, _LANE) for d in dims_in]
    p_out = [_round_up(d, _LANE) for d in dims_out]

    # Batch tile: sublane friendly (multiple of 16 for bf16 packing); pad batch.
    tb = min(tile_b, _round_up(batch, 16))
    bp = _round_up(batch, tb)
    grid = (bp // tb,)

    # Zero-pad params; weights cast to the compute dtype, biases stay fp32.
    flat = []
    for (w, b), pi, po in zip(params, p_in, p_out):
        fin, fout = w.shape
        w_p = jnp.pad(w, ((0, pi - fin), (0, po - fout))).astype(compute_dtype)
        b_p = jnp.pad(b.reshape(1, -1), ((0, 0), (0, po - fout))).astype(jnp.float32)
        flat.extend([w_p, b_p])

    x_p = jnp.pad(x, ((0, bp - batch), (0, p_in[0] - n_input))).astype(jnp.float32)

    # Specs: x / outputs tiled over batch; params resident (index_map -> (0,0)).
    in_specs = [pl.BlockSpec((tb, p_in[0]), lambda i: (i, 0))]
    for pi, po in zip(p_in, p_out):
        in_specs.append(pl.BlockSpec((pi, po), lambda i: (0, 0)))
        in_specs.append(pl.BlockSpec((1, po), lambda i: (0, 0)))

    out_dims = [p_out[7], p_out[0], p_out[1], p_out[2], p_out[3]]  # xbar,h1,h2,h3,z
    out_shape = tuple(jax.ShapeDtypeStruct((bp, d), jnp.float32) for d in out_dims)
    out_specs = tuple(pl.BlockSpec((tb, d), lambda i: (i, 0)) for d in out_dims)

    # Cost estimate + VMEM budget (keep headroom under v7x's 64 MiB VMEM).
    itemsize = jnp.dtype(compute_dtype).itemsize
    param_bytes = sum(pi * po * itemsize + po * 4 for pi, po in zip(p_in, p_out))
    flops = 2 * bp * sum(pi * po for pi, po in zip(p_in, p_out))
    io_bytes = bp * p_in[0] * 4 + bp * sum(out_dims) * 4
    cost = pl.CostEstimate(flops=int(flops), transcendentals=0,
                           bytes_accessed=int(param_bytes + io_bytes))

    tile_io_bytes = 2 * tb * p_in[0] * 4 + 2 * tb * sum(out_dims) * 4  # dbl-buffered
    act_bytes = 4 * tb * max(p_out) * 4
    vmem_est = param_bytes + tile_io_bytes + act_bytes
    vmem_limit = int(min(max(2 * vmem_est, 32 * 1024 * 1024), 60 * 1024 * 1024))

    outs = pl.pallas_call(
        functools.partial(_ae_kernel, compute_dtype=compute_dtype),
        out_shape=out_shape,
        grid=grid,
        in_specs=in_specs,
        out_specs=out_specs,
        compiler_params=pltpu.CompilerParams(
            dimension_semantics=("parallel",),
            vmem_limit_bytes=vmem_limit,
        ),
        cost_estimate=cost,
    )(x_p, *flat)

    x_bar_p, h1_p, h2_p, h3_p, z_p = outs
    return (
        x_bar_p[:batch, :n_input],
        h1_p[:batch, :dims_out[0]],
        h2_p[:batch, :dims_out[1]],
        h3_p[:batch, :dims_out[2]],
        z_p[:batch, :dims_out[3]],
    )


def _reference_forward(x, params, compute_dtype=jnp.float32):
    """Pure-JAX reference mirroring the kernel's compute dtype."""
    def lin(a, wb):
        w, b = wb
        return jnp.dot(a.astype(compute_dtype), w.astype(compute_dtype),
                       preferred_element_type=jnp.float32) + b.reshape(1, -1)
    h1 = jax.nn.relu(lin(x, params[0]))
    h2 = jax.nn.relu(lin(h1, params[1]))
    h3 = jax.nn.relu(lin(h2, params[2]))
    z = lin(h3, params[3])
    d1 = jax.nn.relu(lin(z, params[4]))
    d2 = jax.nn.relu(lin(d1, params[5]))
    d3 = jax.nn.relu(lin(d2, params[6]))
    xb = lin(d3, params[7])
    return xb, h1, h2, h3, z


if __name__ == "__main__":
    # Small shapes consistent with the module's constructor signature.
    n_input, n_z = 16, 8
    n_enc_1, n_enc_2, n_enc_3 = 32, 32, 16
    n_dec_1, n_dec_2, n_dec_3 = 16, 32, 32
    batch = 8

    key = jax.random.PRNGKey(0)
    k_x, k_p = jax.random.split(key)
    x = jax.random.normal(k_x, (batch, n_input), jnp.float32)
    params = init_ae_params(k_p, n_enc_1, n_enc_2, n_enc_3,
                            n_dec_1, n_dec_2, n_dec_3, n_input, n_z)

    # Default fast path: bf16 MXU operands, fp32 accumulation.
    outs_bf16 = jax.block_until_ready(ae_forward(x, params))
    refs_bf16 = _reference_forward(x, params, compute_dtype=jnp.bfloat16)
    for o, r in zip(outs_bf16, refs_bf16):
        assert o.shape == r.shape, (o.shape, r.shape)
        assert jnp.allclose(o, r, atol=1e-2, rtol=1e-2), float(
            jnp.max(jnp.abs(o - r)))

    # Exact fp32 path (matches the torch module numerics).
    outs_f32 = jax.block_until_ready(
        ae_forward(x, params, compute_dtype=jnp.float32))
    refs_f32 = _reference_forward(x, params, compute_dtype=jnp.float32)
    for o, r in zip(outs_f32, refs_f32):
        assert o.shape == r.shape, (o.shape, r.shape)
        assert jnp.allclose(o, r, atol=1e-4, rtol=1e-4), float(
            jnp.max(jnp.abs(o - r)))

    print("KERNEL_OK")
</pallas_src>

<mosaic_0001>
module attributes {stable_mosaic.version = 11 : i64} {
  func.func @_ae_kernel(%arg0: i32, %arg1: memref<16x128xf32, #tpu.memory_space<vmem>>, %arg2: memref<128x128xbf16, #tpu.memory_space<vmem>>, %arg3: memref<1x128xf32, #tpu.memory_space<vmem>>, %arg4: memref<128x128xbf16, #tpu.memory_space<vmem>>, %arg5: memref<1x128xf32, #tpu.memory_space<vmem>>, %arg6: memref<128x128xbf16, #tpu.memory_space<vmem>>, %arg7: memref<1x128xf32, #tpu.memory_space<vmem>>, %arg8: memref<128x128xbf16, #tpu.memory_space<vmem>>, %arg9: memref<1x128xf32, #tpu.memory_space<vmem>>, %arg10: memref<128x128xbf16, #tpu.memory_space<vmem>>, %arg11: memref<1x128xf32, #tpu.memory_space<vmem>>, %arg12: memref<128x128xbf16, #tpu.memory_space<vmem>>, %arg13: memref<1x128xf32, #tpu.memory_space<vmem>>, %arg14: memref<128x128xbf16, #tpu.memory_space<vmem>>, %arg15: memref<1x128xf32, #tpu.memory_space<vmem>>, %arg16: memref<128x128xbf16, #tpu.memory_space<vmem>>, %arg17: memref<1x128xf32, #tpu.memory_space<vmem>>, %arg18: memref<16x128xf32, #tpu.memory_space<vmem>>, %arg19: memref<16x128xf32, #tpu.memory_space<vmem>>, %arg20: memref<16x128xf32, #tpu.memory_space<vmem>>, %arg21: memref<16x128xf32, #tpu.memory_space<vmem>>, %arg22: memref<16x128xf32, #tpu.memory_space<vmem>>) attributes {dimension_semantics = [#tpu.dimension_semantics<parallel>], iteration_bounds = array<i64: 1>, scalar_prefetch = 0 : i64, scratch_operands = 0 : i64, tpu.core_type = #tpu.core_type<tc>, window_params = [{transform_indices = @transform_0, window_bounds = array<i64: 16, 128>}, {pipeline_mode = #tpu.pipeline_mode<synchronous>, transform_indices = @transform_1, window_bounds = array<i64: 128, 128>}, {pipeline_mode = #tpu.pipeline_mode<synchronous>, transform_indices = @transform_2, window_bounds = array<i64: 1, 128>}, {pipeline_mode = #tpu.pipeline_mode<synchronous>, transform_indices = @transform_3, window_bounds = array<i64: 128, 128>}, {pipeline_mode = #tpu.pipeline_mode<synchronous>, transform_indices = @transform_4, window_bounds = array<i64: 1, 128>}, {pipeline_mode = #tpu.pipeline_mode<synchronous>, transform_indices = @transform_5, window_bounds = array<i64: 128, 128>}, {pipeline_mode = #tpu.pipeline_mode<synchronous>, transform_indices = @transform_6, window_bounds = array<i64: 1, 128>}, {pipeline_mode = #tpu.pipeline_mode<synchronous>, transform_indices = @transform_7, window_bounds = array<i64: 128, 128>}, {pipeline_mode = #tpu.pipeline_mode<synchronous>, transform_indices = @transform_8, window_bounds = array<i64: 1, 128>}, {pipeline_mode = #tpu.pipeline_mode<synchronous>, transform_indices = @transform_9, window_bounds = array<i64: 128, 128>}, {pipeline_mode = #tpu.pipeline_mode<synchronous>, transform_indices = @transform_10, window_bounds = array<i64: 1, 128>}, {pipeline_mode = #tpu.pipeline_mode<synchronous>, transform_indices = @transform_11, window_bounds = array<i64: 128, 128>}, {pipeline_mode = #tpu.pipeline_mode<synchronous>, transform_indices = @transform_12, window_bounds = array<i64: 1, 128>}, {pipeline_mode = #tpu.pipeline_mode<synchronous>, transform_indices = @transform_13, window_bounds = array<i64: 128, 128>}, {pipeline_mode = #tpu.pipeline_mode<synchronous>, transform_indices = @transform_14, window_bounds = array<i64: 1, 128>}, {pipeline_mode = #tpu.pipeline_mode<synchronous>, transform_indices = @transform_15, window_bounds = array<i64: 128, 128>}, {pipeline_mode = #tpu.pipeline_mode<synchronous>, transform_indices = @transform_16, window_bounds = array<i64: 1, 128>}, {transform_indices = @transform_17, window_bounds = array<i64: 16, 128>}, {transform_indices = @transform_18, window_bounds = array<i64: 16, 128>}, {transform_indices = @transform_19, window_bounds = array<i64: 16, 128>}, {transform_indices = @transform_20, window_bounds = array<i64: 16, 128>}, {transform_indices = @transform_21, window_bounds = array<i64: 16, 128>}]} {
    %c0 = arith.constant 0 : index
    %c0_0 = arith.constant 0 : index
    %0 = vector.load %arg1[%c0, %c0_0] : memref<16x128xf32, #tpu.memory_space<vmem>>, vector<16x128xf32>
    %1 = arith.truncf %0 : vector<16x128xf32> to vector<16x128xbf16>
    %c0_1 = arith.constant 0 : index
    %c0_2 = arith.constant 0 : index
    %2 = vector.load %arg2[%c0_1, %c0_2] : memref<128x128xbf16, #tpu.memory_space<vmem>>, vector<128x128xbf16>
    %cst = arith.constant dense<0.000000e+00> : vector<16x128xf32>
    %3 = tpu.matmul %1, %2, %cst {dimension_numbers = #tpu.dot_dimension_numbers<[1], [0], [0], [1], [0, 0, 1, 1], [], []>} : vector<16x128xbf16>, vector<128x128xbf16>, vector<16x128xf32> -> vector<16x128xf32>
    %c0_3 = arith.constant 0 : index
    %c0_4 = arith.constant 0 : index
    %4 = vector.load %arg3[%c0_3, %c0_4] : memref<1x128xf32, #tpu.memory_space<vmem>>, vector<1x128xf32>
    %5 = vector.broadcast %4 : vector<1x128xf32> to vector<16x128xf32>
    %6 = arith.addf %3, %5 : vector<16x128xf32>
    %cst_5 = arith.constant 0.000000e+00 : f32
    %7 = vector.broadcast %cst_5 : f32 to vector<16x128xf32>
    %8 = arith.maximumf %6, %7 : vector<16x128xf32>
    %c0_6 = arith.constant 0 : index
    %c0_7 = arith.constant 0 : index
    %9 = vector.load %arg19[%c0_6, %c0_7] : memref<16x128xf32, #tpu.memory_space<vmem>>, vector<16x128xf32>
    tpu.vector_store %arg19[%c0_6, %c0_7], %8 {strides = array<i32>} : memref<16x128xf32, #tpu.memory_space<vmem>>, vector<16x128xf32>,
    %10 = arith.truncf %8 : vector<16x128xf32> to vector<16x128xbf16>
    %c0_8 = arith.constant 0 : index
    %c0_9 = arith.constant 0 : index
    %11 = vector.load %arg4[%c0_8, %c0_9] : memref<128x128xbf16, #tpu.memory_space<vmem>>, vector<128x128xbf16>
    %cst_10 = arith.constant dense<0.000000e+00> : vector<16x128xf32>
    %12 = tpu.matmul %10, %11, %cst_10 {dimension_numbers = #tpu.dot_dimension_numbers<[1], [0], [0], [1], [0, 0, 1, 1], [], []>} : vector<16x128xbf16>, vector<128x128xbf16>, vector<16x128xf32> -> vector<16x128xf32>
    %c0_11 = arith.constant 0 : index
    %c0_12 = arith.constant 0 : index
    %13 = vector.load %arg5[%c0_11, %c0_12] : memref<1x128xf32, #tpu.memory_space<vmem>>, vector<1x128xf32>
    %14 = vector.broadcast %13 : vector<1x128xf32> to vector<16x128xf32>
    %15 = arith.addf %12, %14 : vector<16x128xf32>
    %cst_13 = arith.constant 0.000000e+00 : f32
    %16 = vector.broadcast %cst_13 : f32 to vector<16x128xf32>
    %17 = arith.maximumf %15, %16 : vector<16x128xf32>
    %c0_14 = arith.constant 0 : index
    %c0_15 = arith.constant 0 : index
    %18 = vector.load %arg20[%c0_14, %c0_15] : memref<16x128xf32, #tpu.memory_space<vmem>>, vector<16x128xf32>
    tpu.vector_store %arg20[%c0_14, %c0_15], %17 {strides = array<i32>} : memref<16x128xf32, #tpu.memory_space<vmem>>, vector<16x128xf32>,
    %19 = arith.truncf %17 : vector<16x128xf32> to vector<16x128xbf16>
    %c0_16 = arith.constant 0 : index
    %c0_17 = arith.constant 0 : index
    %20 = vector.load %arg6[%c0_16, %c0_17] : memref<128x128xbf16, #tpu.memory_space<vmem>>, vector<128x128xbf16>
    %cst_18 = arith.constant dense<0.000000e+00> : vector<16x128xf32>
    %21 = tpu.matmul %19, %20, %cst_18 {dimension_numbers = #tpu.dot_dimension_numbers<[1], [0], [0], [1], [0, 0, 1, 1], [], []>} : vector<16x128xbf16>, vector<128x128xbf16>, vector<16x128xf32> -> vector<16x128xf32>
    %c0_19 = arith.constant 0 : index
    %c0_20 = arith.constant 0 : index
    %22 = vector.load %arg7[%c0_19, %c0_20] : memref<1x128xf32, #tpu.memory_space<vmem>>, vector<1x128xf32>
    %23 = vector.broadcast %22 : vector<1x128xf32> to vector<16x128xf32>
    %24 = arith.addf %21, %23 : vector<16x128xf32>
    %cst_21 = arith.constant 0.000000e+00 : f32
    %25 = vector.broadcast %cst_21 : f32 to vector<16x128xf32>
    %26 = arith.maximumf %24, %25 : vector<16x128xf32>
    %c0_22 = arith.constant 0 : index
    %c0_23 = arith.constant 0 : index
    %27 = vector.load %arg21[%c0_22, %c0_23] : memref<16x128xf32, #tpu.memory_space<vmem>>, vector<16x128xf32>
    tpu.vector_store %arg21[%c0_22, %c0_23], %26 {strides = array<i32>} : memref<16x128xf32, #tpu.memory_space<vmem>>, vector<16x128xf32>,
    %28 = arith.truncf %26 : vector<16x128xf32> to vector<16x128xbf16>
    %c0_24 = arith.constant 0 : index
    %c0_25 = arith.constant 0 : index
    %29 = vector.load %arg8[%c0_24, %c0_25] : memref<128x128xbf16, #tpu.memory_space<vmem>>, vector<128x128xbf16>
    %cst_26 = arith.constant dense<0.000000e+00> : vector<16x128xf32>
    %30 = tpu.matmul %28, %29, %cst_26 {dimension_numbers = #tpu.dot_dimension_numbers<[1], [0], [0], [1], [0, 0, 1, 1], [], []>} : vector<16x128xbf16>, vector<128x128xbf16>, vector<16x128xf32> -> vector<16x128xf32>
    %c0_27 = arith.constant 0 : index
    %c0_28 = arith.constant 0 : index
    %31 = vector.load %arg9[%c0_27, %c0_28] : memref<1x128xf32, #tpu.memory_space<vmem>>, vector<1x128xf32>
    %32 = vector.broadcast %31 : vector<1x128xf32> to vector<16x128xf32>
    %33 = arith.addf %30, %32 : vector<16x128xf32>
    %c0_29 = arith.constant 0 : index
    %c0_30 = arith.constant 0 : index
    %34 = vector.load %arg22[%c0_29, %c0_30] : memref<16x128xf32, #tpu.memory_space<vmem>>, vector<16x128xf32>
    tpu.vector_store %arg22[%c0_29, %c0_30], %33 {strides = array<i32>} : memref<16x128xf32, #tpu.memory_space<vmem>>, vector<16x128xf32>,
    %35 = arith.truncf %33 : vector<16x128xf32> to vector<16x128xbf16>
    %c0_31 = arith.constant 0 : index
    %c0_32 = arith.constant 0 : index
    %36 = vector.load %arg10[%c0_31, %c0_32] : memref<128x128xbf16, #tpu.memory_space<vmem>>, vector<128x128xbf16>
    %cst_33 = arith.constant dense<0.000000e+00> : vector<16x128xf32>
    %37 = tpu.matmul %35, %36, %cst_33 {dimension_numbers = #tpu.dot_dimension_numbers<[1], [0], [0], [1], [0, 0, 1, 1], [], []>} : vector<16x128xbf16>, vector<128x128xbf16>, vector<16x128xf32> -> vector<16x128xf32>
    %c0_34 = arith.constant 0 : index
    %c0_35 = arith.constant 0 : index
    %38 = vector.load %arg11[%c0_34, %c0_35] : memref<1x128xf32, #tpu.memory_space<vmem>>, vector<1x128xf32>
    %39 = vector.broadcast %38 : vector<1x128xf32> to vector<16x128xf32>
    %40 = arith.addf %37, %39 : vector<16x128xf32>
    %cst_36 = arith.constant 0.000000e+00 : f32
    %41 = vector.broadcast %cst_36 : f32 to vector<16x128xf32>
    %42 = arith.maximumf %40, %41 : vector<16x128xf32>
    %43 = arith.truncf %42 : vector<16x128xf32> to vector<16x128xbf16>
    %c0_37 = arith.constant 0 : index
    %c0_38 = arith.constant 0 : index
    %44 = vector.load %arg12[%c0_37, %c0_38] : memref<128x128xbf16, #tpu.memory_space<vmem>>, vector<128x128xbf16>
    %cst_39 = arith.constant dense<0.000000e+00> : vector<16x128xf32>
    %45 = tpu.matmul %43, %44, %cst_39 {dimension_numbers = #tpu.dot_dimension_numbers<[1], [0], [0], [1], [0, 0, 1, 1], [], []>} : vector<16x128xbf16>, vector<128x128xbf16>, vector<16x128xf32> -> vector<16x128xf32>
    %c0_40 = arith.constant 0 : index
    %c0_41 = arith.constant 0 : index
    %46 = vector.load %arg13[%c0_40, %c0_41] : memref<1x128xf32, #tpu.memory_space<vmem>>, vector<1x128xf32>
    %47 = vector.broadcast %46 : vector<1x128xf32> to vector<16x128xf32>
    %48 = arith.addf %45, %47 : vector<16x128xf32>
    %cst_42 = arith.constant 0.000000e+00 : f32
    %49 = vector.broadcast %cst_42 : f32 to vector<16x128xf32>
    %50 = arith.maximumf %48, %49 : vector<16x128xf32>
    %51 = arith.truncf %50 : vector<16x128xf32> to vector<16x128xbf16>
    %c0_43 = arith.constant 0 : index
    %c0_44 = arith.constant 0 : index
    %52 = vector.load %arg14[%c0_43, %c0_44] : memref<128x128xbf16, #tpu.memory_space<vmem>>, vector<128x128xbf16>
    %cst_45 = arith.constant dense<0.000000e+00> : vector<16x128xf32>
    %53 = tpu.matmul %51, %52, %cst_45 {dimension_numbers = #tpu.dot_dimension_numbers<[1], [0], [0], [1], [0, 0, 1, 1], [], []>} : vector<16x128xbf16>, vector<128x128xbf16>, vector<16x128xf32> -> vector<16x128xf32>
    %c0_46 = arith.constant 0 : index
    %c0_47 = arith.constant 0 : index
    %54 = vector.load %arg15[%c0_46, %c0_47] : memref<1x128xf32, #tpu.memory_space<vmem>>, vector<1x128xf32>
    %55 = vector.broadcast %54 : vector<1x128xf32> to vector<16x128xf32>
    %56 = arith.addf %53, %55 : vector<16x128xf32>
    %cst_48 = arith.constant 0.000000e+00 : f32
    %57 = vector.broadcast %cst_48 : f32 to vector<16x128xf32>
    %58 = arith.maximumf %56, %57 : vector<16x128xf32>
    %59 = arith.truncf %58 : vector<16x128xf32> to vector<16x128xbf16>
    %c0_49 = arith.constant 0 : index
    %c0_50 = arith.constant 0 : index
    %60 = vector.load %arg16[%c0_49, %c0_50] : memref<128x128xbf16, #tpu.memory_space<vmem>>, vector<128x128xbf16>
    %cst_51 = arith.constant dense<0.000000e+00> : vector<16x128xf32>
    %61 = tpu.matmul %59, %60, %cst_51 {dimension_numbers = #tpu.dot_dimension_numbers<[1], [0], [0], [1], [0, 0, 1, 1], [], []>} : vector<16x128xbf16>, vector<128x128xbf16>, vector<16x128xf32> -> vector<16x128xf32>
    %c0_52 = arith.constant 0 : index
    %c0_53 = arith.constant 0 : index
    %62 = vector.load %arg17[%c0_52, %c0_53] : memref<1x128xf32, #tpu.memory_space<vmem>>, vector<1x128xf32>
    %63 = vector.broadcast %62 : vector<1x128xf32> to vector<16x128xf32>
    %64 = arith.addf %61, %63 : vector<16x128xf32>
    %c0_54 = arith.constant 0 : index
    %c0_55 = arith.constant 0 : index
    %65 = vector.load %arg18[%c0_54, %c0_55] : memref<16x128xf32, #tpu.memory_space<vmem>>, vector<16x128xf32>
    tpu.vector_store %arg18[%c0_54, %c0_55], %64 {strides = array<i32>} : memref<16x128xf32, #tpu.memory_space<vmem>>, vector<16x128xf32>,
    return
  }
  func.func @transform_0(%arg0: i32) -> (i32, i32) {
    %c0_i32 = arith.constant 0 : i32
    %c0_i32_0 = arith.constant 0 : i32
    return %arg0, %c0_i32 : i32, i32
  }
  func.func @transform_1(%arg0: i32) -> (i32, i32) {
    %c0_i32 = arith.constant 0 : i32
    %c0_i32_0 = arith.constant 0 : i32
    %c0_i32_1 = arith.constant 0 : i32
    return %c0_i32, %c0_i32_0 : i32, i32
  }
  func.func @transform_2(%arg0: i32) -> (i32, i32) {
    %c0_i32 = arith.constant 0 : i32
    %c0_i32_0 = arith.constant 0 : i32
    %c0_i32_1 = arith.constant 0 : i32
    return %c0_i32, %c0_i32_0 : i32, i32
  }
  func.func @transform_3(%arg0: i32) -> (i32, i32) {
    %c0_i32 = arith.constant 0 : i32
    %c0_i32_0 = arith.constant 0 : i32
    %c0_i32_1 = arith.constant 0 : i32
    return %c0_i32, %c0_i32_0 : i32, i32
  }
  func.func @transform_4(%arg0: i32) -> (i32, i32) {
    %c0_i32 = arith.constant 0 : i32
    %c0_i32_0 = arith.constant 0 : i32
    %c0_i32_1 = arith.constant 0 : i32
    return %c0_i32, %c0_i32_0 : i32, i32
  }
  func.func @transform_5(%arg0: i32) -> (i32, i32) {
    %c0_i32 = arith.constant 0 : i32
    %c0_i32_0 = arith.constant 0 : i32
    %c0_i32_1 = arith.constant 0 : i32
    return %c0_i32, %c0_i32_0 : i32, i32
  }
  func.func @transform_6(%arg0: i32) -> (i32, i32) {
    %c0_i32 = arith.constant 0 : i32
    %c0_i32_0 = arith.constant 0 : i32
    %c0_i32_1 = arith.constant 0 : i32
    return %c0_i32, %c0_i32_0 : i32, i32
  }
  func.func @transform_7(%arg0: i32) -> (i32, i32) {
    %c0_i32 = arith.constant 0 : i32
    %c0_i32_0 = arith.constant 0 : i32
    %c0_i32_1 = arith.constant 0 : i32
    return %c0_i32, %c0_i32_0 : i32, i32
  }
  func.func @transform_8(%arg0: i32) -> (i32, i32) {
    %c0_i32 = arith.constant 0 : i32
    %c0_i32_0 = arith.constant 0 : i32
    %c0_i32_1 = arith.constant 0 : i32
    return %c0_i32, %c0_i32_0 : i32, i32
  }
  func.func @transform_9(%arg0: i32) -> (i32, i32) {
    %c0_i32 = arith.constant 0 : i32
    %c0_i32_0 = arith.constant 0 : i32
    %c0_i32_1 = arith.constant 0 : i32
    return %c0_i32, %c0_i32_0 : i32, i32
  }
  func.func @transform_10(%arg0: i32) -> (i32, i32) {
    %c0_i32 = arith.constant 0 : i32
    %c0_i32_0 = arith.constant 0 : i32
    %c0_i32_1 = arith.constant 0 : i32
    return %c0_i32, %c0_i32_0 : i32, i32
  }
  func.func @transform_11(%arg0: i32) -> (i32, i32) {
    %c0_i32 = arith.constant 0 : i32
    %c0_i32_0 = arith.constant 0 : i32
    %c0_i32_1 = arith.constant 0 : i32
    return %c0_i32, %c0_i32_0 : i32, i32
  }
  func.func @transform_12(%arg0: i32) -> (i32, i32) {
    %c0_i32 = arith.constant 0 : i32
    %c0_i32_0 = arith.constant 0 : i32
    %c0_i32_1 = arith.constant 0 : i32
    return %c0_i32, %c0_i32_0 : i32, i32
  }
  func.func @transform_13(%arg0: i32) -> (i32, i32) {
    %c0_i32 = arith.constant 0 : i32
    %c0_i32_0 = arith.constant 0 : i32
    %c0_i32_1 = arith.constant 0 : i32
    return %c0_i32, %c0_i32_0 : i32, i32
  }
  func.func @transform_14(%arg0: i32) -> (i32, i32) {
    %c0_i32 = arith.constant 0 : i32
    %c0_i32_0 = arith.constant 0 : i32
    %c0_i32_1 = arith.constant 0 : i32
    return %c0_i32, %c0_i32_0 : i32, i32
  }
  func.func @transform_15(%arg0: i32) -> (i32, i32) {
    %c0_i32 = arith.constant 0 : i32
    %c0_i32_0 = arith.constant 0 : i32
    %c0_i32_1 = arith.constant 0 : i32
    return %c0_i32, %c0_i32_0 : i32, i32
  }
  func.func @transform_16(%arg0: i32) -> (i32, i32) {
    %c0_i32 = arith.constant 0 : i32
    %c0_i32_0 = arith.constant 0 : i32
    %c0_i32_1 = arith.constant 0 : i32
    return %c0_i32, %c0_i32_0 : i32, i32
  }
  func.func @transform_17(%arg0: i32) -> (i32, i32) {
    %c0_i32 = arith.constant 0 : i32
    %c0_i32_0 = arith.constant 0 : i32
    return %arg0, %c0_i32 : i32, i32
  }
  func.func @transform_18(%arg0: i32) -> (i32, i32) {
    %c0_i32 = arith.constant 0 : i32
    %c0_i32_0 = arith.constant 0 : i32
    return %arg0, %c0_i32 : i32, i32
  }
  func.func @transform_19(%arg0: i32) -> (i32, i32) {
    %c0_i32 = arith.constant 0 : i32
    %c0_i32_0 = arith.constant 0 : i32
    return %arg0, %c0_i32 : i32, i32
  }
  func.func @transform_20(%arg0: i32) -> (i32, i32) {
    %c0_i32 = arith.constant 0 : i32
    %c0_i32_0 = arith.constant 0 : i32
    return %arg0, %c0_i32 : i32, i32
  }
  func.func @transform_21(%arg0: i32) -> (i32, i32) {
    %c0_i32 = arith.constant 0 : i32
    %c0_i32_0 = arith.constant 0 : i32
    return %arg0, %c0_i32 : i32, i32
  }
}

</mosaic_0001>

<bundles_post_ra>
// kernel: ae_forward.1
= control target key start
LH: loop header
LB: loop body
LE: loop exit
PB: predicated region body
PF: predicated region fallthrough
CT: control target
= control target key end

     0   :  { %s1459_s1 = inlined_call_operand.vmem [shape: bf16[128,128], index: 1, kind: input, shape index: {}]   ;;  %s1460_s3 = inlined_call_operand.vmem [shape: bf16[128,128], index: 3, kind: input, shape index: {}]   ;;  %s1461_s2 = inlined_call_operand.vmem [shape: f32[1,128], index: 2, kind: input, shape index: {}]   ;;  %s1462_s0 = inlined_call_operand.vmem [shape: f32[16,128], index: 0, kind: input, shape index: {}]   ;;  %s1463_s4 = inlined_call_operand.vmem [shape: f32[1,128], index: 4, kind: input, shape index: {}]   ;;  %s1464_s5 = inlined_call_operand.vmem [shape: bf16[128,128], index: 5, kind: input, shape index: {}]   ;;  %s1465_s18 = inlined_call_operand.vmem [shape: f32[16,128], index: 18, kind: output, shape index: {1}]   ;;  %s1466_s6 = inlined_call_operand.vmem [shape: f32[1,128], index: 6, kind: input, shape index: {}]   ;;  %s1467_s7 = inlined_call_operand.vmem [shape: bf16[128,128], index: 7, kind: input, shape index: {}]   ;;  %s1468_s19 = inlined_call_operand.vmem [shape: f32[16,128], index: 19, kind: output, shape index: {2}]   ;;  %s1469_s8 = inlined_call_operand.vmem [shape: f32[1,128], index: 8, kind: input, shape index: {}]   ;;  %s1470_s9 = inlined_call_operand.vmem [shape: bf16[128,128], index: 9, kind: input, shape index: {}]   ;;  %s1471_s20 = inlined_call_operand.vmem [shape: f32[16,128], index: 20, kind: output, shape index: {3}]   ;;  %s1472_s10 = inlined_call_operand.vmem [shape: f32[1,128], index: 10, kind: input, shape index: {}]   ;;  %s1473_s11 = inlined_call_operand.vmem [shape: bf16[128,128], index: 11, kind: input, shape index: {}]   ;;  %s1474_s21 = inlined_call_operand.vmem [shape: f32[16,128], index: 21, kind: output, shape index: {4}]   ;;  %s1475_s12 = inlined_call_operand.vmem [shape: f32[1,128], index: 12, kind: input, shape index: {}]   ;;  %s1476_s13 = inlined_call_operand.vmem [shape: bf16[128,128], index: 13, kind: input, shape index: {}]   ;;  %s1477_s14 = inlined_call_operand.vmem [shape: f32[1,128], index: 14, kind: input, shape index: {}]   ;;  %s1478_s15 = inlined_call_operand.vmem [shape: bf16[128,128], index: 15, kind: input, shape index: {}]   ;;  %s1479_s16 = inlined_call_operand.vmem [shape: f32[1,128], index: 16, kind: input, shape index: {}]   ;;  %s1480_s17 = inlined_call_operand.vmem [shape: f32[16,128], index: 17, kind: output, shape index: {0}]  }
   0x1   :  { %1485 = sst [smem:[#allocation2_spill]] %s1459_s1  ;;  %v1056_v35 = vld [vmem:[%s1467_s7 + $0x38] sm:$0xff]  ;;  %v1055_v36 = vld [vmem:[%s1467_s7 + $0x30] sm:$0xff]  ;;  %v1054_v37 = vld [vmem:[%s1467_s7 + $0x28] sm:$0xff] }
   0x2   :  { %1486 = sst [smem:[#allocation3_spill]] %s1460_s3  ;;  %393 = vmatpush.bf16.msra.mxu3 %v1056_v35  ;;  %v1053_v38 = vld [vmem:[%s1467_s7 + $0x20] sm:$0xff]  ;;  %v1052_v47 = vld [vmem:[%s1467_s7 + $0x18] sm:$0xff]  ;;  %v1051_v48 = vld [vmem:[%s1467_s7 + $0x10] sm:$0xff] }
   0x3   :  { %1487 = sst [smem:[#allocation4_spill]] %s1461_s2  ;;  %v1050_v49 = vld [vmem:[%s1467_s7 + $0x8] sm:$0xff]  ;;  %v1049_v50 = vld [vmem:[%s1467_s7] sm:$0xff]  ;;  %v1064_v51 = vld [vmem:[%s1470_s9 + $0x38] sm:$0xff] }
   0x4   :  { %1488 = sst [smem:[#allocation5_spill]] %s1462_s0  ;;  %v1063_v52 = vld [vmem:[%s1470_s9 + $0x30] sm:$0xff]  ;;  %v1062_v53 = vld [vmem:[%s1470_s9 + $0x28] sm:$0xff]  ;;  %v1061_v54 = vld [vmem:[%s1470_s9 + $0x20] sm:$0xff] }
   0x5   :  { %1489 = sst [smem:[#allocation6_spill]] %s1463_s4  ;;  %v1091_v55 = vld [vmem:[%s1466_s6] ss:$0 sm:$0xff]  ;;  %v1060_v56 = vld [vmem:[%s1470_s9 + $0x18] sm:$0xff]  ;;  %v1086_v35 = vld [vmem:[%s1478_s15 + $0x28] sm:$0xff] }
   0x6   :  { %1490 = sst [smem:[#allocation7_spill]] %s1464_s5  ;;  %394 = vmatpush.bf16.msra.mxu3 %v1055_v36  ;;  %v1085_v36 = vld [vmem:[%s1478_s15 + $0x20] sm:$0xff] }
   0x7   :  { %s1491_s26 = sld [smem:[#allocation2_spill]] }
   0x8   :  { %s1492_s1 = sld [smem:[#allocation3_spill]] }
   0x9   :  { %s1493_s2 = sld [smem:[#allocation5_spill]] }
   0xa   :  { %s1494_s24 = sld [smem:[#allocation7_spill]]  ;;  %395 = vmatpush.bf16.msra.mxu3 %v1054_v37 }
   0xb   :  { %s1496_s25 = sld [smem:[#allocation6_spill]] }
   0xd   :  { %v1032_v0 = vld [vmem:[%s1491_s26 + $0x38] sm:$0xff]  ;;  %v1031_v1 = vld [vmem:[%s1491_s26 + $0x30] sm:$0xff]  ;;  %v1030_v4 = vld [vmem:[%s1491_s26 + $0x28] sm:$0xff] }
   0xe   :  { %132 = vmatpush.bf16.msra.mxu0 %v1032_v0  ;;  %v1040_v2 = vld [vmem:[%s1492_s1 + $0x38] sm:$0xff]  ;;  %v1039_v3 = vld [vmem:[%s1492_s1 + $0x30] sm:$0xff]  ;;  %v1038_v5 = vld [vmem:[%s1492_s1 + $0x28] sm:$0xff]  ;;  %396 = vmatpush.bf16.msra.mxu3 %v1053_v38 }
   0xf   :  { %219 = vmatpush.bf16.msra.mxu1 %v1040_v2  ;;  %v1029_v6 = vld [vmem:[%s1491_s26 + $0x20] sm:$0xff]  ;;  %v1028_v8 = vld [vmem:[%s1491_s26 + $0x18] sm:$0xff]  ;;  %v1027_v9 = vld [vmem:[%s1491_s26 + $0x10] sm:$0xff] }
  0x10   :  { %v1037_v7 = vld [vmem:[%s1492_s1 + $0x20] sm:$0xff]  ;;  %v1026_v10 = vld [vmem:[%s1491_s26 + $0x8] sm:$0xff]  ;;  %v1036_v15 = vld [vmem:[%s1492_s1 + $0x18] sm:$0xff] }
  0x11   :  { %v1025_v11 = vld [vmem:[%s1491_s26] sm:$0xff]  ;;  %v62_v13 = vld [vmem:[%s1493_s2 + $0x8] sm:$0xff]  ;;  %v1035_v16 = vld [vmem:[%s1492_s1 + $0x10] sm:$0xff]  ;;  %s1495_s26 = sld [smem:[#allocation4_spill]] }
  0x12   :  { %133 = vmatpush.bf16.msra.mxu0 %v1031_v1  ;;  %v61_v12 = vld [vmem:[%s1493_s2] sm:$0xff]  ;;  %v1034_v17 = vld [vmem:[%s1492_s1 + $0x8] sm:$0xff]  ;;  %v1048_v19 = vld [vmem:[%s1494_s24 + $0x38] sm:$0xff]  ;;  %397 = vmatpush.bf16.msra.mxu3 %v1052_v47 }
  0x13   :  { %220 = vmatpush.bf16.msra.mxu1 %v1039_v3  ;;  %v63_v14 = vpack.c.bf16 %v62_v13, %v61_v12  ;;  %v1033_v18 = vld [vmem:[%s1492_s1] sm:$0xff]  ;;  %306 = vmatpush.bf16.msra.mxu2 %v1048_v19  ;;  %v1047_v20 = vld [vmem:[%s1494_s24 + $0x30] sm:$0xff]  ;;  %v1046_v21 = vld [vmem:[%s1494_s24 + $0x28] sm:$0xff] }
  0x14   :  { %v1045_v22 = vld [vmem:[%s1494_s24 + $0x20] sm:$0xff]  ;;  %v1044_v31 = vld [vmem:[%s1494_s24 + $0x18] sm:$0xff]  ;;  %v1043_v32 = vld [vmem:[%s1494_s24 + $0x10] sm:$0xff] }
  0x15   :  { %v1042_v33 = vld [vmem:[%s1494_s24 + $0x8] sm:$0xff]  ;;  %v1041_v34 = vld [vmem:[%s1494_s24] sm:$0xff]  ;;  %v1059_v0 = vld [vmem:[%s1470_s9 + $0x10] sm:$0xff] }
  0x16   :  { %134 = vmatpush.bf16.msra.mxu0 %v1030_v4  ;;  %v1090_v39 = vld [vmem:[%s1496_s25] ss:$0 sm:$0xff]  ;;  %398 = vmatpush.bf16.msra.mxu3 %v1051_v48  ;;  %v1058_v1 = vld [vmem:[%s1470_s9 + $0x8] sm:$0xff]  ;;  %v1072_v3 = vld [vmem:[%s1473_s11 + $0x38] sm:$0xff] }
  0x17   :  { %221 = vmatpush.bf16.msra.mxu1 %v1038_v5  ;;  %307 = vmatpush.bf16.msra.mxu2 %v1047_v20  ;;  %v1089_v23 = vld [vmem:[%s1495_s26] ss:$0 sm:$0xff]  ;;  %v1071_v4 = vld [vmem:[%s1473_s11 + $0x30] sm:$0xff]  ;;  %v1070_v5 = vld [vmem:[%s1473_s11 + $0x28] sm:$0xff] }
  0x18   :  { %v1057_v2 = vld [vmem:[%s1470_s9] sm:$0xff]  ;;  %v1068_v13 = vld [vmem:[%s1473_s11 + $0x18] sm:$0xff]  ;;  %v1078_v19 = vld [vmem:[%s1476_s13 + $0x28] sm:$0xff] }
  0x19   :  { %v1077_v20 = vld [vmem:[%s1476_s13 + $0x20] sm:$0xff]  ;;  %v1082_v47 = vld [vmem:[%s1478_s15 + $0x8] sm:$0xff] }
  0x1a   :  { %135 = vmatpush.bf16.msra.mxu0 %v1029_v6  ;;  %399 = vmatpush.bf16.msra.mxu3 %v1050_v49  ;;  %v1069_v6 = vld [vmem:[%s1473_s11 + $0x20] sm:$0xff] }
  0x1b   :  { %222 = vmatpush.bf16.msra.mxu1 %v1037_v7  ;;  %308 = vmatpush.bf16.msra.mxu2 %v1046_v21  ;;  %v1092_v7 = vld [vmem:[%s1469_s8] ss:$0 sm:$0xff] }
  0x1c   :  { %v1094_v38 = vld [vmem:[%s1475_s12] ss:$0 sm:$0xff] }
  0x1d   :  { %v1081_v48 = vld [vmem:[%s1478_s15] sm:$0xff] }
  0x1e   :  { %136 = vmatpush.bf16.msra.mxu0 %v1028_v8  ;;  %400 = vmatpush.bf16.msra.mxu3 %v1049_v50  ;;  %v1095_v50 = vld [vmem:[%s1477_s14] ss:$0 sm:$0xff] }
  0x1f   :  { %223 = vmatpush.bf16.msra.mxu1 %v1036_v15  ;;  %309 = vmatpush.bf16.msra.mxu2 %v1045_v22  ;;  %v1066_v15 = vld [vmem:[%s1473_s11 + $0x8] sm:$0xff]  ;;  %v1093_v22 = vld [vmem:[%s1472_s10] ss:$0 sm:$0xff] }
  0x22   :  { %137 = vmatpush.bf16.msra.mxu0 %v1027_v9 }
  0x23   :  { %224 = vmatpush.bf16.msra.mxu1 %v1035_v16  ;;  %310 = vmatpush.bf16.msra.mxu2 %v1044_v31  ;;  %v1065_v16 = vld [vmem:[%s1473_s11] sm:$0xff]  ;;  %v1074_v31 = vld [vmem:[%s1476_s13 + $0x8] sm:$0xff] }
  0x26   :  { %138 = vmatpush.bf16.msra.mxu0 %v1026_v10 }
  0x27   :  { %225 = vmatpush.bf16.msra.mxu1 %v1034_v17  ;;  %311 = vmatpush.bf16.msra.mxu2 %v1043_v32  ;;  %v1080_v17 = vld [vmem:[%s1476_s13 + $0x38] sm:$0xff]  ;;  %v1073_v32 = vld [vmem:[%s1476_s13] sm:$0xff] }
  0x2a   :  { %139 = vmatpush.bf16.msra.mxu0 %v1025_v11 }
  0x2b   :  { %226 = vmatpush.bf16.msra.mxu1 %v1033_v18  ;;  %312 = vmatpush.bf16.msra.mxu2 %v1042_v33  ;;  %v1079_v18 = vld [vmem:[%s1476_s13 + $0x30] sm:$0xff]  ;;  %v1088_v33 = vld [vmem:[%s1478_s15 + $0x38] sm:$0xff] }
  0x2c   :  { %733 = vmatpush.bf16.msrb.mxu3 %v1088_v33 }
  0x2d   :  { %140 = vmatmul.bf16.vlgmr.msra.gmra.mxu0 %v63_v14  ;;  %v1067_v14 = vld [vmem:[%s1473_s11 + $0x10] sm:$0xff] }
  0x2e   :  { %478 = vmatpush.bf16.msrb.mxu0 %v1064_v51 }
  0x2f   :  { %313 = vmatpush.bf16.msra.mxu2 %v1041_v34  ;;  %563 = vmatpush.bf16.msrb.mxu1 %v1072_v3  ;;  %v1087_v34 = vld [vmem:[%s1478_s15 + $0x30] sm:$0xff] }
  0x30   :  { %734 = vmatpush.bf16.msrb.mxu3 %v1087_v34 }
  0x32   :  { %479 = vmatpush.bf16.msrb.mxu0 %v1063_v52 }
  0x33   :  { %564 = vmatpush.bf16.msrb.mxu1 %v1071_v4  ;;  %648 = vmatpush.bf16.msrb.mxu2 %v1080_v17 }
  0x34   :  { %735 = vmatpush.bf16.msrb.mxu3 %v1086_v35 }
  0x36   :  { %480 = vmatpush.bf16.msrb.mxu0 %v1062_v53 }
  0x37   :  { %565 = vmatpush.bf16.msrb.mxu1 %v1070_v5  ;;  %649 = vmatpush.bf16.msrb.mxu2 %v1079_v18 }
  0x38   :  { %736 = vmatpush.bf16.msrb.mxu3 %v1085_v36 }
  0x3a   :  { %481 = vmatpush.bf16.msrb.mxu0 %v1061_v54 }
  0x3b   :  { %566 = vmatpush.bf16.msrb.mxu1 %v1069_v6  ;;  %650 = vmatpush.bf16.msrb.mxu2 %v1078_v19 }
  0x3e   :  { %482 = vmatpush.bf16.msrb.mxu0 %v1060_v56 }
  0x3f   :  { %567 = vmatpush.bf16.msrb.mxu1 %v1068_v13  ;;  %651 = vmatpush.bf16.msrb.mxu2 %v1077_v20 }
  0x42   :  { %483 = vmatpush.bf16.msrb.mxu0 %v1059_v0 }
  0x43   :  { %568 = vmatpush.bf16.msrb.mxu1 %v1067_v14 }
  0x46   :  { %484 = vmatpush.bf16.msrb.mxu0 %v1058_v1 }
  0x47   :  { %569 = vmatpush.bf16.msrb.mxu1 %v1066_v15 }
  0x4a   :  { %485 = vmatpush.bf16.msrb.mxu0 %v1057_v2 }
  0x4b   :  { %570 = vmatpush.bf16.msrb.mxu1 %v1065_v16 }
  0xaa   :  { %v141_v24 = vpop.f32.mrf.mxu0 }
  0xab   :  { %v142_v25 = vadd.f32 %v1089_v23, %v141_v24 }
  0xad   :  { %v146_v26 = vmax.f32 %v142_v25, 0.0 }
  0xaf   :  { %148 = vst [vmem:[%s1465_s18] sm:$0xff] %v146_v26 }
  0xb2   :  { %v143_v27 = vpop.f32.mrf.mxu0 }
  0xb3   :  { %v144_v28 = vadd.f32 %v1089_v23, %v143_v27 }
  0xb5   :  { %v147_v29 = vmax.f32 %v144_v28, 0.0 }
  0xb7   :  { %149 = vst [vmem:[%s1465_s18 + $0x8] sm:$0xff] %v147_v29  ;;  %v150_v30 = vpack.c.bf16 %v147_v29, %v146_v26  ;;  %v1076_v29 = vld [vmem:[%s1476_s13 + $0x18] sm:$0xff] }
  0xb8   :  { %652 = vmatpush.bf16.msrb.mxu2 %v1076_v29 }
  0xb9   :  { %227 = vmatmul.bf16.vlgmr.msra.gmra.mxu1 %v150_v30  ;;  %v1075_v30 = vld [vmem:[%s1476_s13 + $0x10] sm:$0xff] }
  0xbc   :  { %653 = vmatpush.bf16.msrb.mxu2 %v1075_v30 }
  0xc0   :  { %654 = vmatpush.bf16.msrb.mxu2 %v1074_v31 }
  0xc4   :  { %655 = vmatpush.bf16.msrb.mxu2 %v1073_v32 }
 0x136   :  { %v228_v40 = vpop.f32.mrf.mxu1 }
 0x137   :  { %v229_v41 = vadd.f32 %v1090_v39, %v228_v40 }
 0x139   :  { %v233_v42 = vmax.f32 %v229_v41, 0.0 }
 0x13b   :  { %235 = vst [vmem:[%s1468_s19] sm:$0xff] %v233_v42 }
 0x13e   :  { %v230_v43 = vpop.f32.mrf.mxu1 }
 0x13f   :  { %v231_v44 = vadd.f32 %v1090_v39, %v230_v43 }
 0x141   :  { %v234_v45 = vmax.f32 %v231_v44, 0.0 }
 0x143   :  { %236 = vst [vmem:[%s1468_s19 + $0x8] sm:$0xff] %v234_v45  ;;  %v237_v46 = vpack.c.bf16 %v234_v45, %v233_v42  ;;  %v1084_v45 = vld [vmem:[%s1478_s15 + $0x18] sm:$0xff] }
 0x144   :  { %737 = vmatpush.bf16.msrb.mxu3 %v1084_v45 }
 0x145   :  { %314 = vmatmul.bf16.vlgmr.msra.gmra.mxu2 %v237_v46  ;;  %v1083_v46 = vld [vmem:[%s1478_s15 + $0x10] sm:$0xff] }
 0x148   :  { %738 = vmatpush.bf16.msrb.mxu3 %v1083_v46 }
 0x14c   :  { %739 = vmatpush.bf16.msrb.mxu3 %v1082_v47 }
 0x150   :  { %740 = vmatpush.bf16.msrb.mxu3 %v1081_v48 }
 0x1c8   :  { %v315_v57 = vpop.f32.mrf.mxu2 }
 0x1c9   :  { %v316_v58 = vadd.f32 %v1091_v55, %v315_v57  ;;  %v1096_v57 = vld [vmem:[%s1479_s16] ss:$0 sm:$0xff] }
 0x1cb   :  { %v320_v59 = vmax.f32 %v316_v58, 0.0 }
 0x1cd   :  { %322 = vst [vmem:[%s1471_s20] sm:$0xff] %v320_v59 }
 0x1d0   :  { %v317_v60 = vpop.f32.mrf.mxu2 }
 0x1d1   :  { %v318_v61 = vadd.f32 %v1091_v55, %v317_v60 }
 0x1d3   :  { %v321_v62 = vmax.f32 %v318_v61, 0.0 }
 0x1d5   :  { %323 = vst [vmem:[%s1471_s20 + $0x8] sm:$0xff] %v321_v62  ;;  %v324_v63 = vpack.c.bf16 %v321_v62, %v320_v59 }
 0x1d7   :  { %401 = vmatmul.bf16.vlgmr.msra.gmra.mxu3 %v324_v63 }
 0x25a   :  { %v402_v8 = vpop.f32.mrf.mxu3 }
 0x25b   :  { %v403_v9 = vadd.f32 %v1092_v7, %v402_v8 }
 0x25d   :  { %407 = vst [vmem:[%s1474_s21] sm:$0xff] %v403_v9 }
 0x262   :  { %v404_v10 = vpop.f32.mrf.mxu3 }
 0x263   :  { %v405_v11 = vadd.f32 %v1092_v7, %v404_v10 }
 0x265   :  { %408 = vst [vmem:[%s1474_s21 + $0x8] sm:$0xff] %v405_v11  ;;  %v409_v12 = vpack.c.bf16 %v405_v11, %v403_v9 }
 0x267   :  { %486 = vmatmul.bf16.vlgmr.msrb.gmra.mxu0 %v409_v12 }
 0x2e4   :  { %v487_v21 = vpop.f32.mrf.mxu0 }
 0x2e5   :  { %v488_v23 = vadd.f32 %v1093_v22, %v487_v21 }
 0x2e7   :  { %v492_v26 = vmax.f32 %v488_v23, 0.0 }
 0x2ec   :  { %v489_v24 = vpop.f32.mrf.mxu0 }
 0x2ed   :  { %v490_v25 = vadd.f32 %v1093_v22, %v489_v24 }
 0x2ef   :  { %v493_v27 = vmax.f32 %v490_v25, 0.0 }
 0x2f1   :  { %v494_v28 = vpack.c.bf16 %v493_v27, %v492_v26 }
 0x2f3   :  { %571 = vmatmul.bf16.vlgmr.msrb.gmra.mxu1 %v494_v28 }
 0x370   :  { %v572_v37 = vpop.f32.mrf.mxu1 }
 0x371   :  { %v573_v39 = vadd.f32 %v1094_v38, %v572_v37 }
 0x373   :  { %v577_v42 = vmax.f32 %v573_v39, 0.0 }
 0x378   :  { %v574_v40 = vpop.f32.mrf.mxu1 }
 0x379   :  { %v575_v41 = vadd.f32 %v1094_v38, %v574_v40 }
 0x37b   :  { %v578_v43 = vmax.f32 %v575_v41, 0.0 }
 0x37d   :  { %v579_v44 = vpack.c.bf16 %v578_v43, %v577_v42 }
 0x37f   :  { %656 = vmatmul.bf16.vlgmr.msrb.gmra.mxu2 %v579_v44 }
 0x402   :  { %v657_v49 = vpop.f32.mrf.mxu2 }
 0x403   :  { %v658_v51 = vadd.f32 %v1095_v50, %v657_v49 }
 0x405   :  { %v662_v54 = vmax.f32 %v658_v51, 0.0 }
 0x40a   :  { %v659_v52 = vpop.f32.mrf.mxu2 }
 0x40b   :  { %v660_v53 = vadd.f32 %v1095_v50, %v659_v52 }
 0x40d   :  { %v663_v55 = vmax.f32 %v660_v53, 0.0 }
 0x40f   :  { %v664_v56 = vpack.c.bf16 %v663_v55, %v662_v54 }
 0x411   :  { %741 = vmatmul.bf16.vlgmr.msrb.gmra.mxu3 %v664_v56 }
 0x494   :  { %v742_v58 = vpop.f32.mrf.mxu3 }
 0x495   :  { %v743_v59 = vadd.f32 %v1096_v57, %v742_v58 }
 0x497   :  { %747 = vst [vmem:[%s1480_s17] sm:$0xff] %v743_v59 }
 0x49c   :  { %v744_v60 = vpop.f32.mrf.mxu3 }
 0x49d   :  { %v745_v61 = vadd.f32 %v1096_v57, %v744_v60 }
 0x49f   :  { %748 = vst [vmem:[%s1480_s17 + $0x8] sm:$0xff] %v745_v61 }

</bundles_post_ra>
